<compile_context>
chip_gen: v7x
topology: tpu7x:2x2x1
jax: 0.10.0
libtpu: 0.0.40
codegen_flags: <defaults>
</compile_context>

<pallas_src>
import functools

import jax
import jax.numpy as jnp
from jax import lax
from jax.experimental import pallas as pl
from jax.experimental.pallas import tpu as pltpu

EPS = 1e-5


def _round_up(a, m):
    return (a + m - 1) // m * m


# --------------------------------------------------------------------------
# Fully fused single-call kernel (everything resident in VMEM).
# --------------------------------------------------------------------------
def _fused_kernel(n_rows, mask_rows,
                  x_ref, w1_ref, g1_ref, b1_ref, w2_ref, g2_ref, b2_ref,
                  o_ref):
    inv_n = 1.0 / n_rows

    # ---- Linear 1 (bf16 MXU, f32 accumulate) ----
    h = jnp.dot(x_ref[...], w1_ref[...], preferred_element_type=jnp.float32)

    # Column reductions on the MXU (ones-matmul) instead of XLU axis-0 sums.
    ones = jnp.ones((8, h.shape[0]), jnp.float32)
    s1 = jnp.dot(ones, h, preferred_element_type=jnp.float32)[0:1, :]
    ss1 = jnp.dot(ones, h * h, preferred_element_type=jnp.float32)[0:1, :]

    # ---- BatchNorm 1 folded into a single FMA: y = h * a + c ----
    mean1 = s1 * inv_n
    var1 = ss1 * inv_n - mean1 * mean1
    a1 = g1_ref[...] * lax.rsqrt(var1 + EPS)
    c1 = b1_ref[...] - mean1 * a1
    y = h * a1 + c1
    if mask_rows:
        # Zero padded batch rows so they cannot pollute the layer-2 stats.
        row = lax.broadcasted_iota(jnp.int32, y.shape, 0)
        y = jnp.where(row < n_rows, y, 0.0)
    y = jnp.maximum(y, 0.0)

    # ---- Linear 2 ----
    z = jnp.dot(y.astype(jnp.bfloat16), w2_ref[...],
                preferred_element_type=jnp.float32)

    s2 = jnp.dot(ones, z, preferred_element_type=jnp.float32)[0:1, :]
    ss2 = jnp.dot(ones, z * z, preferred_element_type=jnp.float32)[0:1, :]

    # ---- BatchNorm 2 ----
    mean2 = s2 * inv_n
    var2 = ss2 * inv_n - mean2 * mean2
    a2 = g2_ref[...] * lax.rsqrt(var2 + EPS)
    c2 = b2_ref[...] - mean2 * a2
    o_ref[...] = z * a2 + c2


# --------------------------------------------------------------------------
# Multi-pass path (large problems).
# Pass 1: H = X @ W1 accumulated in the resident output block + column stats.
# --------------------------------------------------------------------------
def _linear1_kernel(x_ref, w1_ref, h_ref, s1_ref, ss1_ref):
    i = pl.program_id(0)          # batch tile
    k = pl.program_id(1)          # in_features (reduction) tile
    nk = pl.num_programs(1)

    @pl.when(jnp.logical_and(i == 0, k == 0))
    def _():
        s1_ref[...] = jnp.zeros_like(s1_ref)
        ss1_ref[...] = jnp.zeros_like(ss1_ref)

    @pl.when(k == 0)
    def _():
        h_ref[...] = jnp.zeros_like(h_ref)

    # Accumulate directly into the resident f32 output block (no scratch).
    h_ref[...] += jnp.dot(x_ref[...], w1_ref[...],
                          preferred_element_type=jnp.float32)

    @pl.when(k == nk - 1)
    def _():
        h = h_ref[...]
        ones = jnp.ones((8, h.shape[0]), jnp.float32)
        s1_ref[...] += jnp.dot(ones, h,
                               preferred_element_type=jnp.float32)[0:1, :]
        ss1_ref[...] += jnp.dot(ones, h * h,
                                preferred_element_type=jnp.float32)[0:1, :]


# --------------------------------------------------------------------------
# Pass 2: fused BN1 (scale/shift FMA) + ReLU + Z = y @ W2 + column stats of Z
# --------------------------------------------------------------------------
def _bn_relu_linear2_kernel(n_rows, tile_n, mask_rows,
                            h_ref, s1_ref, ss1_ref, g1_ref, b1_ref, w2_ref,
                            z_ref, s2_ref, ss2_ref):
    i = pl.program_id(0)
    inv_n = 1.0 / n_rows

    @pl.when(i == 0)
    def _():
        s2_ref[...] = jnp.zeros_like(s2_ref)
        ss2_ref[...] = jnp.zeros_like(ss2_ref)

    # BatchNorm folded into a single FMA: y = h * a + c
    mean = s1_ref[...] * inv_n
    var = ss1_ref[...] * inv_n - mean * mean
    a = g1_ref[...] * lax.rsqrt(var + EPS)
    c = b1_ref[...] - mean * a

    y = h_ref[...] * a + c
    if mask_rows:
        # Zero out padded batch rows so they cannot pollute the pass-2 stats.
        row = lax.broadcasted_iota(jnp.int32, y.shape, 0) + i * tile_n
        y = jnp.where(row < n_rows, y, 0.0)
    y = jnp.maximum(y, 0.0)

    z = jnp.dot(y.astype(jnp.bfloat16), w2_ref[...],
                preferred_element_type=jnp.float32)
    z_ref[...] = z

    ones = jnp.ones((8, z.shape[0]), jnp.float32)
    s2_ref[...] += jnp.dot(ones, z,
                           preferred_element_type=jnp.float32)[0:1, :]
    ss2_ref[...] += jnp.dot(ones, z * z,
                            preferred_element_type=jnp.float32)[0:1, :]


# --------------------------------------------------------------------------
# Pass 3: fused BN2 applied per batch tile (lane-dense, 128-wide output)
# --------------------------------------------------------------------------
def _bn2_kernel(n_rows, z_ref, s2_ref, ss2_ref, g2_ref, b2_ref, o_ref):
    inv_n = 1.0 / n_rows
    mean = s2_ref[...] * inv_n
    var = ss2_ref[...] * inv_n - mean * mean
    a = g2_ref[...] * lax.rsqrt(var + EPS)
    c = b2_ref[...] - mean * a
    o_ref[...] = z_ref[...] * a + c


# --------------------------------------------------------------------------
# Wrapper
# --------------------------------------------------------------------------
def _pad2(a, rows, cols, dtype):
    a = a.astype(dtype)
    return jnp.pad(a, ((0, rows - a.shape[0]), (0, cols - a.shape[1])))


@functools.partial(jax.jit, static_argnames=("tile_n", "tile_k", "fuse"))
def projection_head(x, w1, g1, b1, w2, g2, b2, *,
                    tile_n=256, tile_k=512, fuse=None):
    """x: (N, in_features). Weights stored transposed vs PyTorch: (in, out).
    Returns (N, out_features) float32."""
    n, f_in = x.shape
    f_hid = w1.shape[1]
    f_out = w2.shape[1]
    f32, bf16 = jnp.float32, jnp.bfloat16

    k_pad = _round_up(f_in, 128)
    h_pad = _round_up(f_hid, 128)
    o_pad = _round_up(f_out, 128)

    g1p = _pad2(g1.reshape(1, -1), 1, h_pad, f32)     # padded gammas are 0
    b1p = _pad2(b1.reshape(1, -1), 1, h_pad, f32)
    g2p = _pad2(g2.reshape(1, -1), 1, o_pad, f32)
    b2p = _pad2(b2.reshape(1, -1), 1, o_pad, f32)
    w1b = _pad2(w1, k_pad, h_pad, bf16)
    w2b = _pad2(w2, h_pad, o_pad, bf16)

    if fuse is None:
        n8 = _round_up(n, 8)
        est_bytes = (n8 * k_pad * 2 + k_pad * h_pad * 2 + h_pad * o_pad * 2
                     + n8 * o_pad * 4              # output block
                     + n8 * h_pad * 4              # h intermediate (f32)
                     + n8 * o_pad * 4)             # z intermediate (f32)
        fuse = est_bytes <= (6 << 20)              # conservative VMEM budget

    # ================= fused single-call path =================
    if fuse:
        n_pad = _round_up(n, 8)
        xb = _pad2(x, n_pad, k_pad, bf16)
        kernel = functools.partial(_fused_kernel, n, n_pad != n)
        out = pl.pallas_call(
            kernel,
            out_shape=jax.ShapeDtypeStruct((n_pad, o_pad), f32),
            grid_spec=pltpu.PrefetchScalarGridSpec(
                num_scalar_prefetch=0,
                grid=(1,),
                in_specs=[pl.BlockSpec((n_pad, k_pad), lambda i: (0, 0)),
                          pl.BlockSpec((k_pad, h_pad), lambda i: (0, 0)),
                          pl.BlockSpec((1, h_pad), lambda i: (0, 0)),
                          pl.BlockSpec((1, h_pad), lambda i: (0, 0)),
                          pl.BlockSpec((h_pad, o_pad), lambda i: (0, 0)),
                          pl.BlockSpec((1, o_pad), lambda i: (0, 0)),
                          pl.BlockSpec((1, o_pad), lambda i: (0, 0))],
                out_specs=pl.BlockSpec((n_pad, o_pad), lambda i: (0, 0))),
            compiler_params=pltpu.CompilerParams(
                dimension_semantics=("arbitrary",)),
        )(xb, w1b, g1p, b1p, w2b, g2p, b2p)
        return out[:n, :f_out]

    # ================= multi-pass path =================
    tn = _round_up(min(tile_n, _round_up(n, 8)), 8)
    n_pad = _round_up(n, tn)
    tk = min(tile_k, k_pad)
    if k_pad % tk != 0:
        tk = 128                       # k_pad is always a multiple of 128
    nb, nk = n_pad // tn, k_pad // tk

    xb = _pad2(x, n_pad, k_pad, bf16)

    # ---------------- pass 1 ----------------
    h, s1, ss1 = pl.pallas_call(
        _linear1_kernel,
        out_shape=(jax.ShapeDtypeStruct((n_pad, h_pad), f32),
                   jax.ShapeDtypeStruct((1, h_pad), f32),
                   jax.ShapeDtypeStruct((1, h_pad), f32)),
        grid_spec=pltpu.PrefetchScalarGridSpec(
            num_scalar_prefetch=0,
            grid=(nb, nk),
            in_specs=[pl.BlockSpec((tn, tk), lambda i, k: (i, k)),
                      pl.BlockSpec((tk, h_pad), lambda i, k: (k, 0))],
            out_specs=[pl.BlockSpec((tn, h_pad), lambda i, k: (i, 0)),
                       pl.BlockSpec((1, h_pad), lambda i, k: (0, 0)),
                       pl.BlockSpec((1, h_pad), lambda i, k: (0, 0))]),
        compiler_params=pltpu.CompilerParams(
            dimension_semantics=("arbitrary", "arbitrary")),
    )(xb, w1b)

    # ---------------- pass 2 ----------------
    kernel2 = functools.partial(_bn_relu_linear2_kernel, n, tn, n_pad != n)
    z, s2, ss2 = pl.pallas_call(
        kernel2,
        out_shape=(jax.ShapeDtypeStruct((n_pad, o_pad), f32),
                   jax.ShapeDtypeStruct((1, o_pad), f32),
                   jax.ShapeDtypeStruct((1, o_pad), f32)),
        grid_spec=pltpu.PrefetchScalarGridSpec(
            num_scalar_prefetch=0,
            grid=(nb,),
            in_specs=[pl.BlockSpec((tn, h_pad), lambda i: (i, 0)),
                      pl.BlockSpec((1, h_pad), lambda i: (0, 0)),
                      pl.BlockSpec((1, h_pad), lambda i: (0, 0)),
                      pl.BlockSpec((1, h_pad), lambda i: (0, 0)),
                      pl.BlockSpec((1, h_pad), lambda i: (0, 0)),
                      pl.BlockSpec((h_pad, o_pad), lambda i: (0, 0))],
            out_specs=[pl.BlockSpec((tn, o_pad), lambda i: (i, 0)),
                       pl.BlockSpec((1, o_pad), lambda i: (0, 0)),
                       pl.BlockSpec((1, o_pad), lambda i: (0, 0))]),
        compiler_params=pltpu.CompilerParams(
            dimension_semantics=("arbitrary",)),
    )(h, s1, ss1, g1p, b1p, w2b)

    # ---------------- pass 3 ----------------
    kernel3 = functools.partial(_bn2_kernel, n)
    out = pl.pallas_call(
        kernel3,
        out_shape=jax.ShapeDtypeStruct((n_pad, o_pad), f32),
        grid_spec=pltpu.PrefetchScalarGridSpec(
            num_scalar_prefetch=0,
            grid=(nb,),
            in_specs=[pl.BlockSpec((tn, o_pad), lambda i: (i, 0)),
                      pl.BlockSpec((1, o_pad), lambda i: (0, 0)),
                      pl.BlockSpec((1, o_pad), lambda i: (0, 0)),
                      pl.BlockSpec((1, o_pad), lambda i: (0, 0)),
                      pl.BlockSpec((1, o_pad), lambda i: (0, 0))],
            out_specs=pl.BlockSpec((tn, o_pad), lambda i: (i, 0))),
        compiler_params=pltpu.CompilerParams(
            dimension_semantics=("parallel",)),
    )(z, s2, ss2, g2p, b2p)

    return out[:n, :f_out]


# --------------------------------------------------------------------------
# Parameter init (PyTorch-Linear-like) and pure-JAX references
# --------------------------------------------------------------------------
def init_params(key, in_features, hidden_features, out_features):
    k1, k2 = jax.random.split(key, 2)
    lim1 = 1.0 / jnp.sqrt(jnp.float32(in_features))
    lim2 = 1.0 / jnp.sqrt(jnp.float32(hidden_features))
    w1 = jax.random.uniform(k1, (in_features, hidden_features),
                            jnp.float32, -lim1, lim1)
    w2 = jax.random.uniform(k2, (hidden_features, out_features),
                            jnp.float32, -lim2, lim2)
    g1 = jnp.ones((1, hidden_features), jnp.float32)
    b1 = jnp.zeros((1, hidden_features), jnp.float32)
    g2 = jnp.ones((1, out_features), jnp.float32)
    b2 = jnp.zeros((1, out_features), jnp.float32)
    return w1, g1, b1, w2, g2, b2


def _reference(x, w1, g1, b1, w2, g2, b2, matmul_dtype):
    """Pure-JAX reference; matmul operands cast to matmul_dtype, BN in f32."""
    h = jnp.dot(x.astype(matmul_dtype), w1.astype(matmul_dtype),
                preferred_element_type=jnp.float32)
    m = h.mean(0, keepdims=True)
    v = ((h - m) ** 2).mean(0, keepdims=True)
    h = (h - m) * lax.rsqrt(v + EPS) * g1 + b1
    h = jnp.maximum(h, 0.0)
    z = jnp.dot(h.astype(matmul_dtype), w2.astype(matmul_dtype),
                preferred_element_type=jnp.float32)
    m2 = z.mean(0, keepdims=True)
    v2 = ((z - m2) ** 2).mean(0, keepdims=True)
    return (z - m2) * lax.rsqrt(v2 + EPS) * g2 + b2


def reference_bf16(x, *p):
    return _reference(x, *p, matmul_dtype=jnp.bfloat16)


def reference_f32(x, *p):
    return _reference(x, *p, matmul_dtype=jnp.float32)


# TODO(synk): running_mean/running_var buffer updates (momentum) of
# nn.BatchNorm1d are training-state bookkeeping and are not modeled; the
# forward output uses batch statistics exactly as PyTorch does in train().

if __name__ == "__main__":
    key = jax.random.PRNGKey(0)
    kx, kp, kx2, kp2 = jax.random.split(key, 4)

    # --- Test 1: small shapes implied by the module (fused fast path). ---
    batch, f_in, f_hid, f_out = 8, 32, 64, 16
    x = jax.random.normal(kx, (batch, f_in), jnp.float32)
    params = init_params(kp, f_in, f_hid, f_out)

    out = jax.block_until_ready(projection_head(x, *params))
    assert out.shape == (batch, f_out)
    assert bool(jnp.all(jnp.isfinite(out)))
    ref_b = reference_bf16(x, *params)
    ref_f = reference_f32(x, *params)
    assert jnp.allclose(out, ref_b, atol=1e-2, rtol=1e-2)   # same bf16 math
    assert jnp.allclose(out, ref_f, atol=1e-1, rtol=1e-1)   # vs full-f32 module

    # --- Test 2: unaligned shapes, fused path with row masking. ---
    batch2, f_in2, f_hid2, f_out2 = 260, 200, 96, 40
    x2 = jax.random.normal(kx2, (batch2, f_in2), jnp.float32)
    params2 = init_params(kp2, f_in2, f_hid2, f_out2)

    out2 = jax.block_until_ready(projection_head(x2, *params2))
    assert out2.shape == (batch2, f_out2)
    assert bool(jnp.all(jnp.isfinite(out2)))
    ref2_b = reference_bf16(x2, *params2)
    assert jnp.allclose(out2, ref2_b, atol=1e-2, rtol=1e-2)

    # --- Test 3: same data forced down the tiled multi-pass path. ---
    out3 = jax.block_until_ready(
        projection_head(x2, *params2, tile_n=128, tile_k=128, fuse=False))
    assert out3.shape == (batch2, f_out2)
    assert bool(jnp.all(jnp.isfinite(out3)))
    assert jnp.allclose(out3, ref2_b, atol=1e-2, rtol=1e-2)
    assert jnp.allclose(out3, out2, atol=2e-3, rtol=2e-3)   # paths agree

    print("KERNEL_OK")
</pallas_src>

<mosaic_0001>
module attributes {stable_mosaic.version = 11 : i64} {
  func.func @_fused_kernel(%arg0: i32, %arg1: memref<8x128xbf16, #tpu.memory_space<vmem>>, %arg2: memref<128x128xbf16, #tpu.memory_space<vmem>>, %arg3: memref<1x128xf32, #tpu.memory_space<vmem>>, %arg4: memref<1x128xf32, #tpu.memory_space<vmem>>, %arg5: memref<128x128xbf16, #tpu.memory_space<vmem>>, %arg6: memref<1x128xf32, #tpu.memory_space<vmem>>, %arg7: memref<1x128xf32, #tpu.memory_space<vmem>>, %arg8: memref<8x128xf32, #tpu.memory_space<vmem>>) attributes {dimension_semantics = [#tpu.dimension_semantics<arbitrary>], iteration_bounds = array<i64: 1>, scalar_prefetch = 0 : i64, scratch_operands = 0 : i64, tpu.core_type = #tpu.core_type<tc>, window_params = [{pipeline_mode = #tpu.pipeline_mode<synchronous>, transform_indices = @transform_0, window_bounds = array<i64: 8, 128>}, {pipeline_mode = #tpu.pipeline_mode<synchronous>, transform_indices = @transform_1, window_bounds = array<i64: 128, 128>}, {pipeline_mode = #tpu.pipeline_mode<synchronous>, transform_indices = @transform_2, window_bounds = array<i64: 1, 128>}, {pipeline_mode = #tpu.pipeline_mode<synchronous>, transform_indices = @transform_3, window_bounds = array<i64: 1, 128>}, {pipeline_mode = #tpu.pipeline_mode<synchronous>, transform_indices = @transform_4, window_bounds = array<i64: 128, 128>}, {pipeline_mode = #tpu.pipeline_mode<synchronous>, transform_indices = @transform_5, window_bounds = array<i64: 1, 128>}, {pipeline_mode = #tpu.pipeline_mode<synchronous>, transform_indices = @transform_6, window_bounds = array<i64: 1, 128>}, {pipeline_mode = #tpu.pipeline_mode<synchronous>, transform_indices = @transform_7, window_bounds = array<i64: 8, 128>}]} {
    %c0 = arith.constant 0 : index
    %c0_0 = arith.constant 0 : index
    %0 = vector.load %arg1[%c0, %c0_0] : memref<8x128xbf16, #tpu.memory_space<vmem>>, vector<8x128xbf16>
    %c0_1 = arith.constant 0 : index
    %c0_2 = arith.constant 0 : index
    %1 = vector.load %arg2[%c0_1, %c0_2] : memref<128x128xbf16, #tpu.memory_space<vmem>>, vector<128x128xbf16>
    %cst = arith.constant dense<0.000000e+00> : vector<8x128xf32>
    %2 = tpu.matmul %0, %1, %cst {dimension_numbers = #tpu.dot_dimension_numbers<[1], [0], [0], [1], [0, 0, 1, 1], [], []>} : vector<8x128xbf16>, vector<128x128xbf16>, vector<8x128xf32> -> vector<8x128xf32>
    %cst_3 = arith.constant 1.000000e+00 : f32
    %3 = vector.broadcast %cst_3 : f32 to vector<8x8xf32>
    %cst_4 = arith.constant dense<0.000000e+00> : vector<8x128xf32>
    %4 = tpu.matmul %3, %2, %cst_4 {dimension_numbers = #tpu.dot_dimension_numbers<[1], [0], [0], [1], [0, 0, 1, 1], [], []>} : vector<8x8xf32>, vector<8x128xf32>, vector<8x128xf32> -> vector<8x128xf32>
    %5 = vector.extract_strided_slice %4 {offsets = [0, 0], sizes = [1, 128], strides = [1, 1]} : vector<8x128xf32> to vector<1x128xf32>
    %6 = arith.mulf %2, %2 : vector<8x128xf32>
    %cst_5 = arith.constant dense<0.000000e+00> : vector<8x128xf32>
    %7 = tpu.matmul %3, %6, %cst_5 {dimension_numbers = #tpu.dot_dimension_numbers<[1], [0], [0], [1], [0, 0, 1, 1], [], []>} : vector<8x8xf32>, vector<8x128xf32>, vector<8x128xf32> -> vector<8x128xf32>
    %8 = vector.extract_strided_slice %7 {offsets = [0, 0], sizes = [1, 128], strides = [1, 1]} : vector<8x128xf32> to vector<1x128xf32>
    %cst_6 = arith.constant 1.250000e-01 : f32
    %9 = vector.broadcast %cst_6 : f32 to vector<1x128xf32>
    %10 = arith.mulf %5, %9 : vector<1x128xf32>
    %cst_7 = arith.constant 1.250000e-01 : f32
    %11 = vector.broadcast %cst_7 : f32 to vector<1x128xf32>
    %12 = arith.mulf %8, %11 : vector<1x128xf32>
    %13 = arith.mulf %10, %10 : vector<1x128xf32>
    %14 = arith.subf %12, %13 : vector<1x128xf32>
    %c0_8 = arith.constant 0 : index
    %c0_9 = arith.constant 0 : index
    %15 = vector.load %arg3[%c0_8, %c0_9] : memref<1x128xf32, #tpu.memory_space<vmem>>, vector<1x128xf32>
    %cst_10 = arith.constant 9.99999974E-6 : f32
    %16 = vector.broadcast %cst_10 : f32 to vector<1x128xf32>
    %17 = arith.addf %14, %16 : vector<1x128xf32>
    %18 = math.rsqrt %17 : vector<1x128xf32>
    %19 = arith.mulf %15, %18 : vector<1x128xf32>
    %c0_11 = arith.constant 0 : index
    %c0_12 = arith.constant 0 : index
    %20 = vector.load %arg4[%c0_11, %c0_12] : memref<1x128xf32, #tpu.memory_space<vmem>>, vector<1x128xf32>
    %21 = arith.mulf %10, %19 : vector<1x128xf32>
    %22 = arith.subf %20, %21 : vector<1x128xf32>
    %23 = vector.broadcast %19 : vector<1x128xf32> to vector<8x128xf32>
    %24 = arith.mulf %2, %23 : vector<8x128xf32>
    %25 = vector.broadcast %22 : vector<1x128xf32> to vector<8x128xf32>
    %26 = arith.addf %24, %25 : vector<8x128xf32>
    %cst_13 = arith.constant 0.000000e+00 : f32
    %27 = vector.broadcast %cst_13 : f32 to vector<8x128xf32>
    %28 = arith.maximumf %26, %27 : vector<8x128xf32>
    %29 = arith.truncf %28 : vector<8x128xf32> to vector<8x128xbf16>
    %c0_14 = arith.constant 0 : index
    %c0_15 = arith.constant 0 : index
    %30 = vector.load %arg5[%c0_14, %c0_15] : memref<128x128xbf16, #tpu.memory_space<vmem>>, vector<128x128xbf16>
    %cst_16 = arith.constant dense<0.000000e+00> : vector<8x128xf32>
    %31 = tpu.matmul %29, %30, %cst_16 {dimension_numbers = #tpu.dot_dimension_numbers<[1], [0], [0], [1], [0, 0, 1, 1], [], []>} : vector<8x128xbf16>, vector<128x128xbf16>, vector<8x128xf32> -> vector<8x128xf32>
    %cst_17 = arith.constant dense<0.000000e+00> : vector<8x128xf32>
    %32 = tpu.matmul %3, %31, %cst_17 {dimension_numbers = #tpu.dot_dimension_numbers<[1], [0], [0], [1], [0, 0, 1, 1], [], []>} : vector<8x8xf32>, vector<8x128xf32>, vector<8x128xf32> -> vector<8x128xf32>
    %33 = vector.extract_strided_slice %32 {offsets = [0, 0], sizes = [1, 128], strides = [1, 1]} : vector<8x128xf32> to vector<1x128xf32>
    %34 = arith.mulf %31, %31 : vector<8x128xf32>
    %cst_18 = arith.constant dense<0.000000e+00> : vector<8x128xf32>
    %35 = tpu.matmul %3, %34, %cst_18 {dimension_numbers = #tpu.dot_dimension_numbers<[1], [0], [0], [1], [0, 0, 1, 1], [], []>} : vector<8x8xf32>, vector<8x128xf32>, vector<8x128xf32> -> vector<8x128xf32>
    %36 = vector.extract_strided_slice %35 {offsets = [0, 0], sizes = [1, 128], strides = [1, 1]} : vector<8x128xf32> to vector<1x128xf32>
    %cst_19 = arith.constant 1.250000e-01 : f32
    %37 = vector.broadcast %cst_19 : f32 to vector<1x128xf32>
    %38 = arith.mulf %33, %37 : vector<1x128xf32>
    %cst_20 = arith.constant 1.250000e-01 : f32
    %39 = vector.broadcast %cst_20 : f32 to vector<1x128xf32>
    %40 = arith.mulf %36, %39 : vector<1x128xf32>
    %41 = arith.mulf %38, %38 : vector<1x128xf32>
    %42 = arith.subf %40, %41 : vector<1x128xf32>
    %c0_21 = arith.constant 0 : index
    %c0_22 = arith.constant 0 : index
    %43 = vector.load %arg6[%c0_21, %c0_22] : memref<1x128xf32, #tpu.memory_space<vmem>>, vector<1x128xf32>
    %cst_23 = arith.constant 9.99999974E-6 : f32
    %44 = vector.broadcast %cst_23 : f32 to vector<1x128xf32>
    %45 = arith.addf %42, %44 : vector<1x128xf32>
    %46 = math.rsqrt %45 : vector<1x128xf32>
    %47 = arith.mulf %43, %46 : vector<1x128xf32>
    %c0_24 = arith.constant 0 : index
    %c0_25 = arith.constant 0 : index
    %48 = vector.load %arg7[%c0_24, %c0_25] : memref<1x128xf32, #tpu.memory_space<vmem>>, vector<1x128xf32>
    %49 = arith.mulf %38, %47 : vector<1x128xf32>
    %50 = arith.subf %48, %49 : vector<1x128xf32>
    %51 = vector.broadcast %47 : vector<1x128xf32> to vector<8x128xf32>
    %52 = arith.mulf %31, %51 : vector<8x128xf32>
    %53 = vector.broadcast %50 : vector<1x128xf32> to vector<8x128xf32>
    %54 = arith.addf %52, %53 : vector<8x128xf32>
    %c0_26 = arith.constant 0 : index
    %c0_27 = arith.constant 0 : index
    %55 = vector.load %arg8[%c0_26, %c0_27] : memref<8x128xf32, #tpu.memory_space<vmem>>, vector<8x128xf32>
    tpu.vector_store %arg8[%c0_26, %c0_27], %54 {strides = array<i32>} : memref<8x128xf32, #tpu.memory_space<vmem>>, vector<8x128xf32>,
    return
  }
  func.func @transform_0(%arg0: i32) -> (i32, i32) {
    %c0_i32 = arith.constant 0 : i32
    %c0_i32_0 = arith.constant 0 : i32
    %c0_i32_1 = arith.constant 0 : i32
    return %c0_i32, %c0_i32_0 : i32, i32
  }
  func.func @transform_1(%arg0: i32) -> (i32, i32) {
    %c0_i32 = arith.constant 0 : i32
    %c0_i32_0 = arith.constant 0 : i32
    %c0_i32_1 = arith.constant 0 : i32
    return %c0_i32, %c0_i32_0 : i32, i32
  }
  func.func @transform_2(%arg0: i32) -> (i32, i32) {
    %c0_i32 = arith.constant 0 : i32
    %c0_i32_0 = arith.constant 0 : i32
    %c0_i32_1 = arith.constant 0 : i32
    return %c0_i32, %c0_i32_0 : i32, i32
  }
  func.func @transform_3(%arg0: i32) -> (i32, i32) {
    %c0_i32 = arith.constant 0 : i32
    %c0_i32_0 = arith.constant 0 : i32
    %c0_i32_1 = arith.constant 0 : i32
    return %c0_i32, %c0_i32_0 : i32, i32
  }
  func.func @transform_4(%arg0: i32) -> (i32, i32) {
    %c0_i32 = arith.constant 0 : i32
    %c0_i32_0 = arith.constant 0 : i32
    %c0_i32_1 = arith.constant 0 : i32
    return %c0_i32, %c0_i32_0 : i32, i32
  }
  func.func @transform_5(%arg0: i32) -> (i32, i32) {
    %c0_i32 = arith.constant 0 : i32
    %c0_i32_0 = arith.constant 0 : i32
    %c0_i32_1 = arith.constant 0 : i32
    return %c0_i32, %c0_i32_0 : i32, i32
  }
  func.func @transform_6(%arg0: i32) -> (i32, i32) {
    %c0_i32 = arith.constant 0 : i32
    %c0_i32_0 = arith.constant 0 : i32
    %c0_i32_1 = arith.constant 0 : i32
    return %c0_i32, %c0_i32_0 : i32, i32
  }
  func.func @transform_7(%arg0: i32) -> (i32, i32) {
    %c0_i32 = arith.constant 0 : i32
    %c0_i32_0 = arith.constant 0 : i32
    %c0_i32_1 = arith.constant 0 : i32
    return %c0_i32, %c0_i32_0 : i32, i32
  }
}

</mosaic_0001>

<bundles_post_ra>
// kernel: projection_head.1
= control target key start
LH: loop header
LB: loop body
LE: loop exit
PB: predicated region body
PF: predicated region fallthrough
CT: control target
= control target key end

     0   :  { %v744_v1 = vmov 0.0   ;;  %vm745_vm0 = vmmov 0   ;;  %s903_s0 = inlined_call_operand.vmem [shape: bf16[8,128], index: 0, kind: input, shape index: {}]   ;;  %s904_s1 = inlined_call_operand.vmem [shape: bf16[128,128], index: 1, kind: input, shape index: {}]   ;;  %s905_s2 = inlined_call_operand.vmem [shape: f32[1,128], index: 2, kind: input, shape index: {}]   ;;  %s906_s3 = inlined_call_operand.vmem [shape: f32[1,128], index: 3, kind: input, shape index: {}]   ;;  %s907_s4 = inlined_call_operand.vmem [shape: bf16[128,128], index: 4, kind: input, shape index: {}]   ;;  %s908_s5 = inlined_call_operand.vmem [shape: f32[1,128], index: 5, kind: input, shape index: {}]   ;;  %s909_s6 = inlined_call_operand.vmem [shape: f32[1,128], index: 6, kind: input, shape index: {}]   ;;  %s910_s7 = inlined_call_operand.hbm [shape: f32[8,128], index: 7, kind: output, shape index: {}]  }
   0x1   :  { %v700_v0 = vld [vmem:[%s904_s1] sm:$0xff]   ;;  %636 = vmatprep.subr.bf16.mxu0 %v744_v1  ;;  %656 = vmatprep.subr.mxu1 %v744_v1  ;;  %v701_v2 = vld [vmem:[%s904_s1 + $0x8] sm:$0xff]   ;;  %v702_v3 = vld [vmem:[%s904_s1 + $0x10] sm:$0xff]  }
   0x2   :  { %637 = vmatpush3.bf16.msra.mxu0 %v700_v0  ;;  %652 = vmatprep.mubr.msk.bf16.mxu0 %vm745_vm0, %v744_v1  ;;  %v703_v4 = vld [vmem:[%s904_s1 + $0x18] sm:$0xff]  }
   0x3   :  { %638 = vmatprep.subr.bf16.mxu0 %v744_v1  ;;  %658 = vmatprep.mubr.msk.f32.mxu1 %vm745_vm0, %v744_v1 }
   0x6   :  { %639 = vmatpush3.bf16.msra.mxu0 %v701_v2 }
   0x7   :  { %640 = vmatprep.subr.bf16.mxu0 %v744_v1 }
   0xa   :  { %641 = vmatpush3.bf16.msra.mxu0 %v702_v3 }
   0xb   :  { %642 = vmatprep.subr.bf16.mxu0 %v744_v1 }
   0xc   :  { %12 = vsyncpa [#allocation3], 0  ;;  %v704_v5 = vld [vmem:[%s904_s1 + $0x20] sm:$0xff]   ;;  %v705_v6 = vld [vmem:[%s904_s1 + $0x28] sm:$0xff]   ;;  %vm133_vm1 = vcmask 64512   ;;  %v746_v14 = vmov 1.0   ;;  %v290_v33 = vlaneseq }
   0xd   :  { %v706_v7 = vld [vmem:[%s904_s1 + $0x30] sm:$0xff]   ;;  %v707_v8 = vld [vmem:[%s904_s1 + $0x38] sm:$0xff]   ;;  %v28_v9 = vld [vmem:[%s903_s0] sm:$0xf]  ;;  %s747_s15 = smov [#allocation2]  }
   0xe   :  { %643 = vmatpush3.bf16.msra.mxu0 %v703_v4  ;;  %v708_v16 = vld [vmem:[%s907_s4] sm:$0xff]   ;;  %v709_v17 = vld [vmem:[%s907_s4 + $0x8] sm:$0xff]   ;;  %v710_v18 = vld [vmem:[%s907_s4 + $0x10] sm:$0xff]   ;;  %v291_v34 = vshrl.u32 %v290_v33, 7  ;;  %s582_s16 = sshll.u32 %s747_s15, 4  ;;  %s583_s16 = int_to_ptr.vmem [resolvable:$true] %s582_s16 }
   0xf   :  { %644 = vmatprep.subr.bf16.mxu0 %v744_v1  ;;  %v711_v19 = vld [vmem:[%s907_s4 + $0x18] sm:$0xff]   ;;  %v712_v20 = vld [vmem:[%s907_s4 + $0x20] sm:$0xff]   ;;  %v713_v21 = vld [vmem:[%s907_s4 + $0x28] sm:$0xff]   ;;  %s720_s17 = scalar_lea.vmem %s583_s16, 128  ;;  %p725_p1 = scmp.lt.s32.totalorder %s583_s16, %s583_s16 }
  0x10   :  { %v714_v22 = vld [vmem:[%s907_s4 + $0x30] sm:$0xff]   ;;  %v715_v23 = vld [vmem:[%s907_s4 + $0x38] sm:$0xff]   ;;  %v282_v35 = vld [vmem:[%s905_s2] sm:$0x1]  ;;  %v292_v36 = vsub.s32 0, %v291_v34  ;;  %p721_p0 = scmp.ne.s32.totalorder %s583_s16, %s720_s17  ;;  %p726_p2 = scmp.lt.s32.totalorder %s720_s17, %s720_s17 }
  0x11   :  { %v286_v39 = vld [vmem:[%s906_s3] sm:$0x1] }
  0x12   :  { %645 = vmatpush3.bf16.msra.mxu0 %v704_v5  ;;  %v554_v62 = vld [vmem:[%s908_s5] sm:$0x1]  ;;  %p727_p3 = por %p726_p2, %p725_p1 }
  0x13   :  { %646 = vmatprep.subr.bf16.mxu0 %v744_v1 }
  0x14   :  { %p728_p4 = pnand %p727_p3, %p721_p0 }
  0x16   :  { %647 = vmatpush3.bf16.msra.mxu0 %v705_v6 }
  0x17   :  { %648 = vmatprep.subr.bf16.mxu0 %v744_v1 }
  0x1a   :  { %649 = vmatpush3.bf16.msra.mxu0 %v706_v7 }
  0x1b   :  { %650 = vmatprep.subr.bf16.mxu0 %v744_v1 }
  0x1e   :  { %651 = vmatpush3.bf16.msra.mxu0 %v707_v8 }
  0x1f   :  { %686 = vmatprep.subr.mxu0 %v744_v1 }
  0x21   :  { %653 = vmatmul.mubr.bf16.vlgmr.msra.gmra.mrb[0].mxu0 %v28_v9 }
  0x22   :  { %688 = vmatprep.mubr.msk.f32.mxu0 %vm745_vm0, %v744_v1 }
  0xf4   :  { %v127_v10 = vpop.f32.mrb[0].mxu0 }
  0xf5   :  { %v207_v11 = vmul.f32 %v127_v10, %v127_v10  ;;  %v654_v12 = vpop.f32.mrb[1].mxu0  ;;  %657 = vmatpush3.msra.mxu1 %v127_v10 }
  0xf6   :  { %v130_v13 = vpop.f32.mrb[2].mxu0  ;;  %659 = vmatmul.mubr.msk.f32.vlgmr.msra.gmra.mrb[0].mxu1 %vm133_vm1, %v746_v14  ;;  %661 = vmatprep.subr.mxu1 %v744_v1 }
  0xf7   :  { %v655_v15 = vpop.f32.mrb[3].mxu0  ;;  %662 = vmatpush3.msra.mxu1 %v207_v11  ;;  %663 = vmatprep.mubr.msk.f32.mxu1 %vm745_vm0, %v744_v1 }
  0xf8   :  { %666 = vmatprep.subr.bf16.mxu1 %v744_v1 }
  0xfa   :  { %664 = vmatmul.mubr.msk.f32.vlgmr.msra.gmra.mrb[2].mxu1 %vm133_vm1, %v746_v14 }
  0xfb   :  { %682 = vmatprep.mubr.msk.bf16.mxu1 %vm745_vm0, %v744_v1  ;;  %667 = vmatpush3.bf16.msra.mxu1 %v708_v16 }
  0xfc   :  { %668 = vmatprep.subr.bf16.mxu1 %v744_v1 }
  0xff   :  { %669 = vmatpush3.bf16.msra.mxu1 %v709_v17 }
 0x100   :  { %670 = vmatprep.subr.bf16.mxu1 %v744_v1 }
 0x103   :  { %671 = vmatpush3.bf16.msra.mxu1 %v710_v18 }
 0x104   :  { %672 = vmatprep.subr.bf16.mxu1 %v744_v1 }
 0x107   :  { %673 = vmatpush3.bf16.msra.mxu1 %v711_v19 }
 0x108   :  { %674 = vmatprep.subr.bf16.mxu1 %v744_v1 }
 0x10b   :  { %675 = vmatpush3.bf16.msra.mxu1 %v712_v20 }
 0x10c   :  { %676 = vmatprep.subr.bf16.mxu1 %v744_v1 }
 0x10f   :  { %677 = vmatpush3.bf16.msra.mxu1 %v713_v21 }
 0x110   :  { %678 = vmatprep.subr.bf16.mxu1 %v744_v1 }
 0x113   :  { %679 = vmatpush3.bf16.msra.mxu1 %v714_v22 }
 0x114   :  { %680 = vmatprep.subr.bf16.mxu1 %v744_v1 }
 0x117   :  { %681 = vmatpush3.bf16.msra.mxu1 %v715_v23 }
 0x1c9   :  { %v203_v24 = vpop.f32.mrb[0].mxu1 }
 0x1ca   :  { %v278_v25 = vmul.f32 0.125, %v203_v24  ;;  %v660_v26 = vpop.f32.mrb[1].mxu1 }
 0x1cc   :  { %v280_v28 = vmul.f32 %v278_v25, %v278_v25 }
 0x1cd   :  { %v274_v27 = vpop.f32.mrb[2].mxu1 }
 0x1ce   :  { %v279_v29 = vmul.f32 0.125, %v274_v27  ;;  %v665_v30 = vpop.f32.mrb[3].mxu1 }
 0x1d0   :  { %v281_v31 = vsub.f32 %v279_v29, %v280_v28 }
 0x1d2   :  { %v283_v32 = vadd.f32 1e-05, %v281_v31 }
 0x1d4   :  { %716 = vrsqrt.f32 %v283_v32 }
 0x1de   :  { %v717_v37 = vpop.eup %716 }
 0x1df   :  { %v285_v38 = vmul.f32 %v717_v37, %v282_v35 }
 0x1e1   :  { %v287_v40 = vmul.f32 %v285_v38, %v278_v25  ;;  %v293_v41 = vrot.slane %v285_v38, %v292_v36 }
 0x1e3   :  { %v288_v42 = vsub.f32 %v286_v39, %v287_v40  ;;  %v295_v43 = vmul.f32 %v293_v41, %v127_v10 }
 0x1e5   :  { %v300_v44 = vrot.slane %v288_v42, %v292_v36 }
 0x1e7   :  { %v302_v45 = vadd.f32 %v300_v44, %v295_v43 }
 0x1e9   :  { %v303_v46 = vmax.f32 %v302_v45, 0.0 }
 0x1eb   :  { %v304_v47 = vpack.c.bf16 %v303_v46, %v303_v46 }
 0x1ed   :  { %683 = vmatmul.mubr.bf16.vlgmr.msra.gmra.mrb[4].mxu1 %v304_v47 }
 0x2c0   :  { %v403_v48 = vpop.f32.mrb[4].mxu1 }
 0x2c1   :  { %v479_v49 = vmul.f32 %v403_v48, %v403_v48  ;;  %v684_v50 = vpop.f32.mrb[5].mxu1  ;;  %687 = vmatpush3.msra.mxu0 %v403_v48 }
 0x2c2   :  { %v406_v51 = vpop.f32.mrb[6].mxu1  ;;  %689 = vmatmul.mubr.msk.f32.vlgmr.msra.gmra.mrb[4].mxu0 %vm133_vm1, %v746_v14  ;;  %691 = vmatprep.subr.mxu0 %v744_v1 }
 0x2c3   :  { %v685_v52 = vpop.f32.mrb[7].mxu1  ;;  %692 = vmatpush3.msra.mxu0 %v479_v49  ;;  %693 = vmatprep.mubr.msk.f32.mxu0 %vm745_vm0, %v744_v1  ;;  %v558_v1 = vld [vmem:[%s909_s6] sm:$0x1] }
 0x2c6   :  { %694 = vmatmul.mubr.msk.f32.vlgmr.msra.gmra.mrb[6].mxu0 %vm133_vm1, %v746_v14 }
 0x395   :  { %v475_v53 = vpop.f32.mrb[4].mxu0 }
 0x396   :  { %v550_v54 = vmul.f32 0.125, %v475_v53  ;;  %v690_v55 = vpop.f32.mrb[5].mxu0 }
 0x398   :  { %v552_v57 = vmul.f32 %v550_v54, %v550_v54 }
 0x399   :  { %v546_v56 = vpop.f32.mrb[6].mxu0 }
 0x39a   :  { %v551_v58 = vmul.f32 0.125, %v546_v56  ;;  %v695_v59 = vpop.f32.mrb[7].mxu0 }
 0x39c   :  { %v553_v60 = vsub.f32 %v551_v58, %v552_v57 }
 0x39e   :  { %v555_v61 = vadd.f32 1e-05, %v553_v60 }
 0x3a0   :  { %718 = vrsqrt.f32 %v555_v61 }
 0x3aa   :  { %v719_v63 = vpop.eup %718 }
 0x3ab   :  { %v557_v0 = vmul.f32 %v719_v63, %v554_v62 }
 0x3ad   :  { %v559_v2 = vmul.f32 %v557_v0, %v550_v54  ;;  %v565_v3 = vrot.slane %v557_v0, %v292_v36 }
 0x3af   :  { %v560_v4 = vsub.f32 %v558_v1, %v559_v2  ;;  %v567_v5 = vmul.f32 %v565_v3, %v403_v48 }
 0x3b1   :  { %v572_v6 = vrot.slane %v560_v4, %v292_v36 }
 0x3b3   :  { %v574_v7 = vadd.f32 %v572_v6, %v567_v5 }
 0x3b5   :  { %575 = vst [vmem:[#allocation2] sm:$0xff] %v574_v7 }
 0x3b6   :  { %731 = shalt.err (!%p728_p4)
}
 0x3b7   :  { %s732_s6 = scalar_lea.hbm %s910_s7, 128 }
 0x3b8   :  { %p733_p5 = scmp.ne.s32.totalorder %s910_s7, %s732_s6  ;;  %p736_p6 = scmp.lt.u32.totalorder %s732_s6, %s910_s7 }
 0x3ba   :  { %p738_p7 = pnand %p736_p6, %p733_p5 }
 0x3bc   :  { %741 = shalt.err (!%p738_p7)
}
 0x3bd   :  { %585 = dma.vmem_to_hbm [thread:$0]  %s583_s16, 128, %s910_s7, [#allocation3]  }
 0x3be   :  { %742 = dma.done.wait [#allocation3], 128  }
 0x3bf   :  { %743 = vsyncadd [#allocation3], 4294967168 }
 0x3c0   :  { %589 = vsyncpa [#allocation3], 1 }

</bundles_post_ra>
